<compile_context>
chip_gen: v7x
topology: tpu7x:2x2x1
jax: 0.10.0
libtpu: 0.0.40
codegen_flags: <defaults>
</compile_context>

<pallas_src>
import functools
import math

import jax
import jax.numpy as jnp
import numpy as np
from jax.experimental import pallas as pl
from jax.experimental.pallas import tpu as pltpu


def _msa_kernel(*refs, seq, emb, heads, tq, bblk, single_q, approx_recip):
    if single_q:
        (x_ref, gamma_ref, beta_ref, w_qkv_ref, b_qkv_ref,
         w_o_ref, b_o_ref, o_ref) = refs
        qkv_scr = None
    else:
        (x_ref, gamma_ref, beta_ref, w_qkv_ref, b_qkv_ref,
         w_o_ref, b_o_ref, o_ref, qkv_scr) = refs

    f32 = jnp.float32
    head_dim = emb // heads
    mxu = w_qkv_ref.dtype            # bf16 (perf path) or f32 (validation path)
    n_q_rows = bblk * tq
    eps = 1e-5

    def ln_project():
        # LayerNorm (f32 statistics, biased variance, eps=1e-5: matches torch.nn.LayerNorm)
        # followed by the fused QKV projection over ALL rows of the batch block.
        x = x_ref[...].astype(f32).reshape(bblk * seq, emb)
        mean = jnp.mean(x, axis=-1, keepdims=True)
        var = jnp.mean((x - mean) ** 2, axis=-1, keepdims=True)
        xn = (x - mean) * jax.lax.rsqrt(var + eps) * gamma_ref[...] + beta_ref[...]
        # Softmax scale 1/sqrt(head_dim) is already folded into the Q columns of w_qkv/b_qkv.
        qkv = jnp.dot(xn.astype(mxu), w_qkv_ref[...],
                      preferred_element_type=f32) + b_qkv_ref[...]
        return qkv.astype(mxu).reshape(bblk, seq, 3 * emb)

    if single_q:
        qkv3 = ln_project()                                    # stays in registers
        q3 = qkv3[:, :, :emb]                                  # (bblk, S, E)
        k3 = qkv3[:, :, emb:2 * emb]                           # (bblk, S, E)
        v3 = qkv3[:, :, 2 * emb:]                              # (bblk, S, E)
    else:
        # Compute LN + fused QKV once per batch block; reuse for every q step.
        @pl.when(pl.program_id(1) == 0)
        def _():
            qkv_scr[...] = ln_project()

        q0 = pl.multiple_of(pl.program_id(1) * tq, tq)
        q3 = qkv_scr[:, pl.ds(q0, tq), 0:emb]                  # (bblk, Tq, E)
        k3 = qkv_scr[:, :, emb:2 * emb]                        # (bblk, S, E)
        v3 = qkv_scr[:, :, 2 * emb:3 * emb]                    # (bblk, S, E)

    # ---- per-head attention; contexts kept in registers (no scratch, no masked stores) ----
    ctx_parts = []
    for h in range(heads):
        lo = h * head_dim
        hi = lo + head_dim
        qh = q3[:, :, lo:hi]                                   # (bblk, Tq, Dh)
        kh = k3[:, :, lo:hi]                                   # (bblk, S, Dh)
        vh = v3[:, :, lo:hi]                                   # (bblk, S, Dh)

        s = jnp.einsum('bqd,bkd->bqk', qh, kh,
                       preferred_element_type=f32)             # (bblk, Tq, S)
        m = jnp.max(s, axis=-1, keepdims=True)
        e = jnp.exp(s - m)
        denom = jnp.sum(e, axis=-1, keepdims=True)
        if approx_recip:
            p = e * pl.reciprocal(denom, approx=True)          # EUP slot (bf16 path only)
        else:
            p = e / denom                                      # exact (f32 validation path)

        ctx_parts.append(
            jnp.einsum('bqk,bkd->bqd', p.astype(mxu), vh,
                       preferred_element_type=f32).astype(mxu))  # (bblk, Tq, Dh)

    ctx = jnp.concatenate(ctx_parts, axis=-1).reshape(n_q_rows, emb)   # merged heads, registers
    out = jnp.dot(ctx, w_o_ref[...], preferred_element_type=f32) + b_o_ref[...]
    o_ref[...] = out.reshape(bblk, tq, emb).astype(o_ref.dtype)


def _step_bytes(bblk, S, tq, E, itemsize):
    """Rough per-grid-step activation footprint (bytes)."""
    x_blk = 2 * bblk * S * E * 4                # x input block (double buffered)
    qkv = 2 * bblk * S * 3 * E * itemsize       # cached QKV scratch + live copy
    scores = 3 * bblk * tq * S * 4              # scores / exp / probs (one head live)
    ctx_out = 2 * bblk * tq * E * 4             # merged context + output block
    return x_blk + qkv + scores + ctx_out


def _pick_blocks(B, S, E, act_budget, itemsize):
    # Keep >= 2 steps along the parallel batch axis so both v7x TensorCores get work.
    bcap = max(1, B // 2)
    bblk = 1
    for cand in range(1, bcap + 1):
        if B % cand == 0 and _step_bytes(cand, S, S, E, itemsize) <= act_budget:
            bblk = cand
    tq = S
    if _step_bytes(bblk, S, S, E, itemsize) > act_budget:
        for t in (1024, 512, 256, 128, 64, 32, 16, 8):
            if t < S and S % t == 0:
                tq = t
                if _step_bytes(bblk, S, t, E, itemsize) <= act_budget:
                    break
    return bblk, tq


def msa_block(x, gamma, beta, w_in, b_in, w_out, b_out, *, num_heads,
              batch_block=None, q_block=None, mxu_dtype=jnp.bfloat16):
    """x: (B, S, E). gamma/beta: (E,). w_in: (E, 3E) pre-transposed. b_in: (3E,).
       w_out: (E, E) pre-transposed. b_out: (E,)."""
    B, S, E = x.shape
    assert E % num_heads == 0
    Dh = E // num_heads
    scale = 1.0 / math.sqrt(Dh)
    f32 = jnp.float32
    itemsize = jnp.dtype(mxu_dtype).itemsize

    # Per-generation VMEM budget (v7x: 64 MiB/TC, v5e/v6e: 128 MiB).
    try:
        vmem_cap = int(pltpu.get_tpu_info().vmem_capacity_bytes)
    except Exception:
        vmem_cap = 64 * 1024 * 1024            # conservative fallback (v7x per-TC)
    vmem_limit = (vmem_cap * 3) // 4

    weight_bytes = (E * 3 * E + E * E) * itemsize + 6 * E * 4
    act_budget = max(2 << 20, vmem_limit // 3 - weight_bytes)

    if batch_block is None or q_block is None:
        auto_b, auto_q = _pick_blocks(B, S, E, act_budget, itemsize)
    bblk = batch_block if batch_block is not None else auto_b
    tq = q_block if q_block is not None else auto_q
    assert B % bblk == 0 and S % tq == 0
    assert tq == S or tq % 8 == 0
    single_q = (tq == S)

    gamma2 = gamma.reshape(1, E).astype(f32)
    beta2 = beta.reshape(1, E).astype(f32)
    # Fused QKV weights; attention scale folded into the Q columns (zero in-kernel cost).
    w_qkv = jnp.concatenate([w_in[:, :E] * scale, w_in[:, E:]], axis=1).astype(mxu_dtype)
    b_qkv = jnp.concatenate([b_in[:E] * scale, b_in[E:]]).reshape(1, 3 * E).astype(f32)
    w_o = w_out.astype(mxu_dtype)
    b_o = b_out.reshape(1, E).astype(f32)

    kernel = functools.partial(
        _msa_kernel, seq=S, emb=E, heads=num_heads, tq=tq, bblk=bblk,
        single_q=single_q, approx_recip=(mxu_dtype != jnp.float32))

    def const_spec(shape):
        nd = len(shape)
        # Grid-invariant weights/biases: single-buffer (no duplicated VMEM copy).
        return pl.BlockSpec(shape, lambda *_: (0,) * nd,
                            pipeline_mode=pl.Buffered(1))

    if single_q:
        grid = (B // bblk,)
        x_spec = pl.BlockSpec((bblk, S, E), lambda b: (b, 0, 0))
        o_spec = pl.BlockSpec((bblk, S, E), lambda b: (b, 0, 0))
        scratch = []
        dims = ("parallel",)
    else:
        grid = (B // bblk, S // tq)
        x_spec = pl.BlockSpec((bblk, S, E), lambda b, q: (b, 0, 0))
        o_spec = pl.BlockSpec((bblk, tq, E), lambda b, q: (b, q, 0))
        scratch = [pltpu.VMEM((bblk, S, 3 * E), mxu_dtype)]    # cached QKV per batch block
        dims = ("parallel", "arbitrary")

    in_specs = [
        x_spec,
        const_spec((1, E)),          # gamma
        const_spec((1, E)),          # beta
        const_spec((E, 3 * E)),      # fused w_qkv (Q columns pre-scaled)
        const_spec((1, 3 * E)),      # fused b_qkv
        const_spec((E, E)),          # w_out
        const_spec((1, E)),          # b_out
    ]

    return pl.pallas_call(
        kernel,
        out_shape=jax.ShapeDtypeStruct((B, S, E), x.dtype),
        grid_spec=pltpu.PrefetchScalarGridSpec(
            num_scalar_prefetch=0,
            grid=grid,
            in_specs=in_specs,
            out_specs=o_spec,
            scratch_shapes=scratch),
        compiler_params=pltpu.CompilerParams(
            dimension_semantics=dims,
            vmem_limit_bytes=vmem_limit),
    )(x, gamma2, beta2, w_qkv, b_qkv, w_o, b_o)


def msa_block_ref(x, gamma, beta, w_in, b_in, w_out, b_out, *, num_heads):
    """Pure-JAX f32 reference matching PyTorch semantics."""
    B, S, E = x.shape
    Dh = E // num_heads
    mean = jnp.mean(x, axis=-1, keepdims=True)
    var = jnp.mean((x - mean) ** 2, axis=-1, keepdims=True)
    xn = (x - mean) / jnp.sqrt(var + 1e-5) * gamma + beta
    qkv = xn @ w_in + b_in  # (B, S, 3E)
    q, k, v = qkv[..., :E], qkv[..., E:2 * E], qkv[..., 2 * E:]

    def split(t):
        return t.reshape(B, S, num_heads, Dh).transpose(0, 2, 1, 3)  # (B,H,S,Dh)

    qh, kh, vh = split(q), split(k), split(v)
    scores = jnp.einsum('bhqd,bhkd->bhqk', qh, kh) / math.sqrt(Dh)
    p = jax.nn.softmax(scores, axis=-1)
    ctx = jnp.einsum('bhqk,bhkd->bhqd', p, vh)
    ctx = ctx.transpose(0, 2, 1, 3).reshape(B, S, E)
    return ctx @ w_out + b_out


if __name__ == "__main__":
    # Small shapes consistent with the module: embedding_dim=32, num_heads=4.
    B, S, E, H = 2, 8, 32, 4

    key = jax.random.PRNGKey(0)
    kx, kg, kb, kwi, kbi, kwo, kbo, kx2 = jax.random.split(key, 8)

    x = jax.random.normal(kx, (B, S, E), dtype=jnp.float32)

    gamma = 1.0 + 0.1 * jax.random.normal(kg, (E,), dtype=jnp.float32)
    beta = 0.1 * jax.random.normal(kb, (E,), dtype=jnp.float32)

    # MultiheadAttention params (stored pre-transposed for x @ W form).
    w_in = 0.05 * jax.random.normal(kwi, (E, 3 * E), dtype=jnp.float32)
    b_in = 0.01 * jax.random.normal(kbi, (3 * E,), dtype=jnp.float32)
    w_out = 0.05 * jax.random.normal(kwo, (E, E), dtype=jnp.float32)
    b_out = 0.01 * jax.random.normal(kbo, (E,), dtype=jnp.float32)

    ref = msa_block_ref(x, gamma, beta, w_in, b_in, w_out, b_out, num_heads=H)

    # 1) Structural correctness: f32 MXU operands, exact softmax normalization.
    out_f32 = msa_block(x, gamma, beta, w_in, b_in, w_out, b_out,
                        num_heads=H, mxu_dtype=jnp.float32)
    out_f32 = jax.block_until_ready(out_f32)
    np.testing.assert_allclose(np.asarray(out_f32), np.asarray(ref),
                               rtol=2e-3, atol=2e-4)

    # 2) Performance path: bf16 MXU operands, f32 accumulation, approx reciprocal.
    out_bf16 = msa_block(x, gamma, beta, w_in, b_in, w_out, b_out, num_heads=H)
    out_bf16 = jax.block_until_ready(out_bf16)
    np.testing.assert_allclose(np.asarray(out_bf16), np.asarray(ref),
                               rtol=5e-2, atol=1e-2)

    # 3) Exercise the q-tiled path (cached QKV scratch + "arbitrary" q axis) at a larger S.
    S2 = 128
    x2 = jax.random.normal(kx2, (B, S2, E), dtype=jnp.float32)
    ref2 = msa_block_ref(x2, gamma, beta, w_in, b_in, w_out, b_out, num_heads=H)
    out2 = msa_block(x2, gamma, beta, w_in, b_in, w_out, b_out,
                     num_heads=H, batch_block=1, q_block=64)
    out2 = jax.block_until_ready(out2)
    np.testing.assert_allclose(np.asarray(out2), np.asarray(ref2),
                               rtol=5e-2, atol=1e-2)

    print("KERNEL_OK")
</pallas_src>

<mosaic_0001>
module attributes {stable_mosaic.version = 11 : i64} {
  func.func @_msa_kernel(%arg0: i32, %arg1: memref<1x8x32xf32, #tpu.memory_space<vmem>>, %arg2: memref<1x32xf32, #tpu.memory_space<vmem>>, %arg3: memref<1x32xf32, #tpu.memory_space<vmem>>, %arg4: memref<32x96xf32, #tpu.memory_space<vmem>>, %arg5: memref<1x96xf32, #tpu.memory_space<vmem>>, %arg6: memref<32x32xf32, #tpu.memory_space<vmem>>, %arg7: memref<1x32xf32, #tpu.memory_space<vmem>>, %arg8: memref<1x8x32xf32, #tpu.memory_space<vmem>>) attributes {dimension_semantics = [#tpu.dimension_semantics<parallel>], iteration_bounds = array<i64: 2>, scalar_prefetch = 0 : i64, scratch_operands = 0 : i64, tpu.core_type = #tpu.core_type<tc>, window_params = [{transform_indices = @transform_0, window_bounds = array<i64: 1, 8, 32>}, {pipeline_mode = #tpu.pipeline_mode<synchronous>, transform_indices = @transform_1, window_bounds = array<i64: 1, 32>}, {pipeline_mode = #tpu.pipeline_mode<synchronous>, transform_indices = @transform_2, window_bounds = array<i64: 1, 32>}, {pipeline_mode = #tpu.pipeline_mode<synchronous>, transform_indices = @transform_3, window_bounds = array<i64: 32, 96>}, {pipeline_mode = #tpu.pipeline_mode<synchronous>, transform_indices = @transform_4, window_bounds = array<i64: 1, 96>}, {pipeline_mode = #tpu.pipeline_mode<synchronous>, transform_indices = @transform_5, window_bounds = array<i64: 32, 32>}, {pipeline_mode = #tpu.pipeline_mode<synchronous>, transform_indices = @transform_6, window_bounds = array<i64: 1, 32>}, {transform_indices = @transform_7, window_bounds = array<i64: 1, 8, 32>}]} {
    %c0 = arith.constant 0 : index
    %c0_0 = arith.constant 0 : index
    %c0_1 = arith.constant 0 : index
    %0 = vector.load %arg1[%c0, %c0_0, %c0_1] : memref<1x8x32xf32, #tpu.memory_space<vmem>>, vector<1x8x32xf32>
    %1 = vector.shape_cast %0 : vector<1x8x32xf32> to vector<8x32xf32>
    %cst = arith.constant dense<0.000000e+00> : vector<8xf32>
    %2 = vector.multi_reduction <add>, %1, %cst [1] : vector<8x32xf32> to vector<8xf32>
    %3 = vector.shape_cast %2 : vector<8xf32> to vector<8x1xf32>
    %cst_2 = arith.constant 3.200000e+01 : f32
    %4 = vector.broadcast %cst_2 : f32 to vector<8x1xf32>
    %5 = arith.divf %3, %4 : vector<8x1xf32>
    %6 = vector.broadcast %5 : vector<8x1xf32> to vector<8x32xf32>
    %7 = arith.subf %1, %6 : vector<8x32xf32>
    %8 = arith.mulf %7, %7 : vector<8x32xf32>
    %cst_3 = arith.constant dense<0.000000e+00> : vector<8xf32>
    %9 = vector.multi_reduction <add>, %8, %cst_3 [1] : vector<8x32xf32> to vector<8xf32>
    %10 = vector.shape_cast %9 : vector<8xf32> to vector<8x1xf32>
    %cst_4 = arith.constant 3.200000e+01 : f32
    %11 = vector.broadcast %cst_4 : f32 to vector<8x1xf32>
    %12 = arith.divf %10, %11 : vector<8x1xf32>
    %13 = vector.broadcast %5 : vector<8x1xf32> to vector<8x32xf32>
    %14 = arith.subf %1, %13 : vector<8x32xf32>
    %cst_5 = arith.constant 9.99999974E-6 : f32
    %15 = vector.broadcast %cst_5 : f32 to vector<8x1xf32>
    %16 = arith.addf %12, %15 : vector<8x1xf32>
    %17 = math.rsqrt %16 : vector<8x1xf32>
    %18 = vector.broadcast %17 : vector<8x1xf32> to vector<8x32xf32>
    %19 = arith.mulf %14, %18 : vector<8x32xf32>
    %c0_6 = arith.constant 0 : index
    %c0_7 = arith.constant 0 : index
    %20 = vector.load %arg2[%c0_6, %c0_7] : memref<1x32xf32, #tpu.memory_space<vmem>>, vector<1x32xf32>
    %21 = vector.broadcast %20 : vector<1x32xf32> to vector<8x32xf32>
    %22 = arith.mulf %19, %21 : vector<8x32xf32>
    %c0_8 = arith.constant 0 : index
    %c0_9 = arith.constant 0 : index
    %23 = vector.load %arg3[%c0_8, %c0_9] : memref<1x32xf32, #tpu.memory_space<vmem>>, vector<1x32xf32>
    %24 = vector.broadcast %23 : vector<1x32xf32> to vector<8x32xf32>
    %25 = arith.addf %22, %24 : vector<8x32xf32>
    %c0_10 = arith.constant 0 : index
    %c0_11 = arith.constant 0 : index
    %26 = vector.load %arg4[%c0_10, %c0_11] : memref<32x96xf32, #tpu.memory_space<vmem>>, vector<32x96xf32>
    %cst_12 = arith.constant dense<0.000000e+00> : vector<8x96xf32>
    %27 = tpu.matmul %25, %26, %cst_12 {dimension_numbers = #tpu.dot_dimension_numbers<[1], [0], [0], [1], [0, 0, 1, 1], [], []>} : vector<8x32xf32>, vector<32x96xf32>, vector<8x96xf32> -> vector<8x96xf32>
    %c0_13 = arith.constant 0 : index
    %c0_14 = arith.constant 0 : index
    %28 = vector.load %arg5[%c0_13, %c0_14] : memref<1x96xf32, #tpu.memory_space<vmem>>, vector<1x96xf32>
    %29 = vector.broadcast %28 : vector<1x96xf32> to vector<8x96xf32>
    %30 = arith.addf %27, %29 : vector<8x96xf32>
    %31 = vector.shape_cast %30 : vector<8x96xf32> to vector<1x8x96xf32>
    %32 = vector.extract_strided_slice %31 {offsets = [0, 0, 0], sizes = [1, 8, 32], strides = [1, 1, 1]} : vector<1x8x96xf32> to vector<1x8x32xf32>
    %33 = vector.extract_strided_slice %31 {offsets = [0, 0, 32], sizes = [1, 8, 32], strides = [1, 1, 1]} : vector<1x8x96xf32> to vector<1x8x32xf32>
    %34 = vector.extract_strided_slice %31 {offsets = [0, 0, 64], sizes = [1, 8, 32], strides = [1, 1, 1]} : vector<1x8x96xf32> to vector<1x8x32xf32>
    %35 = vector.extract_strided_slice %32 {offsets = [0, 0, 0], sizes = [1, 8, 8], strides = [1, 1, 1]} : vector<1x8x32xf32> to vector<1x8x8xf32>
    %36 = vector.extract_strided_slice %33 {offsets = [0, 0, 0], sizes = [1, 8, 8], strides = [1, 1, 1]} : vector<1x8x32xf32> to vector<1x8x8xf32>
    %37 = vector.extract_strided_slice %34 {offsets = [0, 0, 0], sizes = [1, 8, 8], strides = [1, 1, 1]} : vector<1x8x32xf32> to vector<1x8x8xf32>
    "tpu.trace_start"() <{level = 10 : i32, message = "bqd,bkd->bqk"}> : () -> ()
    %cst_15 = arith.constant dense<0.000000e+00> : vector<1x8x8xf32>
    %38 = tpu.matmul %35, %36, %cst_15 {dimension_numbers = #tpu.dot_dimension_numbers<[2], [2], [1], [1], [0, 0, 0, 1, 1, 1], [0], [0]>} : vector<1x8x8xf32>, vector<1x8x8xf32>, vector<1x8x8xf32> -> vector<1x8x8xf32>
    "tpu.trace_stop"() : () -> ()
    %cst_16 = arith.constant dense<0xFF800000> : vector<1x8xf32>
    %39 = vector.multi_reduction <maximumf>, %38, %cst_16 [2] : vector<1x8x8xf32> to vector<1x8xf32>
    %40 = vector.shape_cast %39 : vector<1x8xf32> to vector<1x8x1xf32>
    %41 = vector.broadcast %40 : vector<1x8x1xf32> to vector<1x8x8xf32>
    %42 = arith.subf %38, %41 : vector<1x8x8xf32>
    %43 = math.exp %42 : vector<1x8x8xf32>
    %cst_17 = arith.constant dense<0.000000e+00> : vector<1x8xf32>
    %44 = vector.multi_reduction <add>, %43, %cst_17 [2] : vector<1x8x8xf32> to vector<1x8xf32>
    %45 = vector.shape_cast %44 : vector<1x8xf32> to vector<1x8x1xf32>
    %46 = vector.broadcast %45 : vector<1x8x1xf32> to vector<1x8x8xf32>
    %47 = arith.divf %43, %46 : vector<1x8x8xf32>
    "tpu.trace_start"() <{level = 10 : i32, message = "bqk,bkd->bqd"}> : () -> ()
    %cst_18 = arith.constant dense<0.000000e+00> : vector<1x8x8xf32>
    %48 = tpu.matmul %47, %37, %cst_18 {dimension_numbers = #tpu.dot_dimension_numbers<[2], [1], [1], [2], [0, 0, 0, 1, 1, 2], [0], [0]>} : vector<1x8x8xf32>, vector<1x8x8xf32>, vector<1x8x8xf32> -> vector<1x8x8xf32>
    "tpu.trace_stop"() : () -> ()
    %49 = vector.extract_strided_slice %32 {offsets = [0, 0, 8], sizes = [1, 8, 8], strides = [1, 1, 1]} : vector<1x8x32xf32> to vector<1x8x8xf32>
    %50 = vector.extract_strided_slice %33 {offsets = [0, 0, 8], sizes = [1, 8, 8], strides = [1, 1, 1]} : vector<1x8x32xf32> to vector<1x8x8xf32>
    %51 = vector.extract_strided_slice %34 {offsets = [0, 0, 8], sizes = [1, 8, 8], strides = [1, 1, 1]} : vector<1x8x32xf32> to vector<1x8x8xf32>
    "tpu.trace_start"() <{level = 10 : i32, message = "bqd,bkd->bqk"}> : () -> ()
    %cst_19 = arith.constant dense<0.000000e+00> : vector<1x8x8xf32>
    %52 = tpu.matmul %49, %50, %cst_19 {dimension_numbers = #tpu.dot_dimension_numbers<[2], [2], [1], [1], [0, 0, 0, 1, 1, 1], [0], [0]>} : vector<1x8x8xf32>, vector<1x8x8xf32>, vector<1x8x8xf32> -> vector<1x8x8xf32>
    "tpu.trace_stop"() : () -> ()
    %cst_20 = arith.constant dense<0xFF800000> : vector<1x8xf32>
    %53 = vector.multi_reduction <maximumf>, %52, %cst_20 [2] : vector<1x8x8xf32> to vector<1x8xf32>
    %54 = vector.shape_cast %53 : vector<1x8xf32> to vector<1x8x1xf32>
    %55 = vector.broadcast %54 : vector<1x8x1xf32> to vector<1x8x8xf32>
    %56 = arith.subf %52, %55 : vector<1x8x8xf32>
    %57 = math.exp %56 : vector<1x8x8xf32>
    %cst_21 = arith.constant dense<0.000000e+00> : vector<1x8xf32>
    %58 = vector.multi_reduction <add>, %57, %cst_21 [2] : vector<1x8x8xf32> to vector<1x8xf32>
    %59 = vector.shape_cast %58 : vector<1x8xf32> to vector<1x8x1xf32>
    %60 = vector.broadcast %59 : vector<1x8x1xf32> to vector<1x8x8xf32>
    %61 = arith.divf %57, %60 : vector<1x8x8xf32>
    "tpu.trace_start"() <{level = 10 : i32, message = "bqk,bkd->bqd"}> : () -> ()
    %cst_22 = arith.constant dense<0.000000e+00> : vector<1x8x8xf32>
    %62 = tpu.matmul %61, %51, %cst_22 {dimension_numbers = #tpu.dot_dimension_numbers<[2], [1], [1], [2], [0, 0, 0, 1, 1, 2], [0], [0]>} : vector<1x8x8xf32>, vector<1x8x8xf32>, vector<1x8x8xf32> -> vector<1x8x8xf32>
    "tpu.trace_stop"() : () -> ()
    %63 = vector.extract_strided_slice %32 {offsets = [0, 0, 16], sizes = [1, 8, 8], strides = [1, 1, 1]} : vector<1x8x32xf32> to vector<1x8x8xf32>
    %64 = vector.extract_strided_slice %33 {offsets = [0, 0, 16], sizes = [1, 8, 8], strides = [1, 1, 1]} : vector<1x8x32xf32> to vector<1x8x8xf32>
    %65 = vector.extract_strided_slice %34 {offsets = [0, 0, 16], sizes = [1, 8, 8], strides = [1, 1, 1]} : vector<1x8x32xf32> to vector<1x8x8xf32>
    "tpu.trace_start"() <{level = 10 : i32, message = "bqd,bkd->bqk"}> : () -> ()
    %cst_23 = arith.constant dense<0.000000e+00> : vector<1x8x8xf32>
    %66 = tpu.matmul %63, %64, %cst_23 {dimension_numbers = #tpu.dot_dimension_numbers<[2], [2], [1], [1], [0, 0, 0, 1, 1, 1], [0], [0]>} : vector<1x8x8xf32>, vector<1x8x8xf32>, vector<1x8x8xf32> -> vector<1x8x8xf32>
    "tpu.trace_stop"() : () -> ()
    %cst_24 = arith.constant dense<0xFF800000> : vector<1x8xf32>
    %67 = vector.multi_reduction <maximumf>, %66, %cst_24 [2] : vector<1x8x8xf32> to vector<1x8xf32>
    %68 = vector.shape_cast %67 : vector<1x8xf32> to vector<1x8x1xf32>
    %69 = vector.broadcast %68 : vector<1x8x1xf32> to vector<1x8x8xf32>
    %70 = arith.subf %66, %69 : vector<1x8x8xf32>
    %71 = math.exp %70 : vector<1x8x8xf32>
    %cst_25 = arith.constant dense<0.000000e+00> : vector<1x8xf32>
    %72 = vector.multi_reduction <add>, %71, %cst_25 [2] : vector<1x8x8xf32> to vector<1x8xf32>
    %73 = vector.shape_cast %72 : vector<1x8xf32> to vector<1x8x1xf32>
    %74 = vector.broadcast %73 : vector<1x8x1xf32> to vector<1x8x8xf32>
    %75 = arith.divf %71, %74 : vector<1x8x8xf32>
    "tpu.trace_start"() <{level = 10 : i32, message = "bqk,bkd->bqd"}> : () -> ()
    %cst_26 = arith.constant dense<0.000000e+00> : vector<1x8x8xf32>
    %76 = tpu.matmul %75, %65, %cst_26 {dimension_numbers = #tpu.dot_dimension_numbers<[2], [1], [1], [2], [0, 0, 0, 1, 1, 2], [0], [0]>} : vector<1x8x8xf32>, vector<1x8x8xf32>, vector<1x8x8xf32> -> vector<1x8x8xf32>
    "tpu.trace_stop"() : () -> ()
    %77 = vector.extract_strided_slice %32 {offsets = [0, 0, 24], sizes = [1, 8, 8], strides = [1, 1, 1]} : vector<1x8x32xf32> to vector<1x8x8xf32>
    %78 = vector.extract_strided_slice %33 {offsets = [0, 0, 24], sizes = [1, 8, 8], strides = [1, 1, 1]} : vector<1x8x32xf32> to vector<1x8x8xf32>
    %79 = vector.extract_strided_slice %34 {offsets = [0, 0, 24], sizes = [1, 8, 8], strides = [1, 1, 1]} : vector<1x8x32xf32> to vector<1x8x8xf32>
    "tpu.trace_start"() <{level = 10 : i32, message = "bqd,bkd->bqk"}> : () -> ()
    %cst_27 = arith.constant dense<0.000000e+00> : vector<1x8x8xf32>
    %80 = tpu.matmul %77, %78, %cst_27 {dimension_numbers = #tpu.dot_dimension_numbers<[2], [2], [1], [1], [0, 0, 0, 1, 1, 1], [0], [0]>} : vector<1x8x8xf32>, vector<1x8x8xf32>, vector<1x8x8xf32> -> vector<1x8x8xf32>
    "tpu.trace_stop"() : () -> ()
    %cst_28 = arith.constant dense<0xFF800000> : vector<1x8xf32>
    %81 = vector.multi_reduction <maximumf>, %80, %cst_28 [2] : vector<1x8x8xf32> to vector<1x8xf32>
    %82 = vector.shape_cast %81 : vector<1x8xf32> to vector<1x8x1xf32>
    %83 = vector.broadcast %82 : vector<1x8x1xf32> to vector<1x8x8xf32>
    %84 = arith.subf %80, %83 : vector<1x8x8xf32>
    %85 = math.exp %84 : vector<1x8x8xf32>
    %cst_29 = arith.constant dense<0.000000e+00> : vector<1x8xf32>
    %86 = vector.multi_reduction <add>, %85, %cst_29 [2] : vector<1x8x8xf32> to vector<1x8xf32>
    %87 = vector.shape_cast %86 : vector<1x8xf32> to vector<1x8x1xf32>
    %88 = vector.broadcast %87 : vector<1x8x1xf32> to vector<1x8x8xf32>
    %89 = arith.divf %85, %88 : vector<1x8x8xf32>
    "tpu.trace_start"() <{level = 10 : i32, message = "bqk,bkd->bqd"}> : () -> ()
    %cst_30 = arith.constant dense<0.000000e+00> : vector<1x8x8xf32>
    %90 = tpu.matmul %89, %79, %cst_30 {dimension_numbers = #tpu.dot_dimension_numbers<[2], [1], [1], [2], [0, 0, 0, 1, 1, 2], [0], [0]>} : vector<1x8x8xf32>, vector<1x8x8xf32>, vector<1x8x8xf32> -> vector<1x8x8xf32>
    "tpu.trace_stop"() : () -> ()
    %91 = tpu.concatenate %48, %62, %76, %90 in 2 : vector<1x8x8xf32>, vector<1x8x8xf32>, vector<1x8x8xf32>, vector<1x8x8xf32> -> vector<1x8x32xf32>
    %92 = vector.shape_cast %91 : vector<1x8x32xf32> to vector<8x32xf32>
    %c0_31 = arith.constant 0 : index
    %c0_32 = arith.constant 0 : index
    %93 = vector.load %arg6[%c0_31, %c0_32] : memref<32x32xf32, #tpu.memory_space<vmem>>, vector<32x32xf32>
    %cst_33 = arith.constant dense<0.000000e+00> : vector<8x32xf32>
    %94 = tpu.matmul %92, %93, %cst_33 {dimension_numbers = #tpu.dot_dimension_numbers<[1], [0], [0], [1], [0, 0, 1, 1], [], []>} : vector<8x32xf32>, vector<32x32xf32>, vector<8x32xf32> -> vector<8x32xf32>
    %c0_34 = arith.constant 0 : index
    %c0_35 = arith.constant 0 : index
    %95 = vector.load %arg7[%c0_34, %c0_35] : memref<1x32xf32, #tpu.memory_space<vmem>>, vector<1x32xf32>
    %96 = vector.broadcast %95 : vector<1x32xf32> to vector<8x32xf32>
    %97 = arith.addf %94, %96 : vector<8x32xf32>
    %98 = vector.shape_cast %97 : vector<8x32xf32> to vector<1x8x32xf32>
    %c0_36 = arith.constant 0 : index
    %c0_37 = arith.constant 0 : index
    %c0_38 = arith.constant 0 : index
    %99 = vector.load %arg8[%c0_36, %c0_37, %c0_38] : memref<1x8x32xf32, #tpu.memory_space<vmem>>, vector<1x8x32xf32>
    tpu.vector_store %arg8[%c0_36, %c0_37, %c0_38], %98 {strides = array<i32>} : memref<1x8x32xf32, #tpu.memory_space<vmem>>, vector<1x8x32xf32>,
    return
  }
  func.func @transform_0(%arg0: i32) -> (i32, i32, i32) {
    %c0_i32 = arith.constant 0 : i32
    %c0_i32_0 = arith.constant 0 : i32
    %c0_i32_1 = arith.constant 0 : i32
    return %arg0, %c0_i32, %c0_i32_0 : i32, i32, i32
  }
  func.func @transform_1(%arg0: i32) -> (i32, i32) {
    %c0_i32 = arith.constant 0 : i32
    %c0_i32_0 = arith.constant 0 : i32
    %c0_i32_1 = arith.constant 0 : i32
    return %c0_i32, %c0_i32_0 : i32, i32
  }
  func.func @transform_2(%arg0: i32) -> (i32, i32) {
    %c0_i32 = arith.constant 0 : i32
    %c0_i32_0 = arith.constant 0 : i32
    %c0_i32_1 = arith.constant 0 : i32
    return %c0_i32, %c0_i32_0 : i32, i32
  }
  func.func @transform_3(%arg0: i32) -> (i32, i32) {
    %c0_i32 = arith.constant 0 : i32
    %c0_i32_0 = arith.constant 0 : i32
    %c0_i32_1 = arith.constant 0 : i32
    return %c0_i32, %c0_i32_0 : i32, i32
  }
  func.func @transform_4(%arg0: i32) -> (i32, i32) {
    %c0_i32 = arith.constant 0 : i32
    %c0_i32_0 = arith.constant 0 : i32
    %c0_i32_1 = arith.constant 0 : i32
    return %c0_i32, %c0_i32_0 : i32, i32
  }
  func.func @transform_5(%arg0: i32) -> (i32, i32) {
    %c0_i32 = arith.constant 0 : i32
    %c0_i32_0 = arith.constant 0 : i32
    %c0_i32_1 = arith.constant 0 : i32
    return %c0_i32, %c0_i32_0 : i32, i32
  }
  func.func @transform_6(%arg0: i32) -> (i32, i32) {
    %c0_i32 = arith.constant 0 : i32
    %c0_i32_0 = arith.constant 0 : i32
    %c0_i32_1 = arith.constant 0 : i32
    return %c0_i32, %c0_i32_0 : i32, i32
  }
  func.func @transform_7(%arg0: i32) -> (i32, i32, i32) {
    %c0_i32 = arith.constant 0 : i32
    %c0_i32_0 = arith.constant 0 : i32
    %c0_i32_1 = arith.constant 0 : i32
    return %arg0, %c0_i32, %c0_i32_0 : i32, i32, i32
  }
}

</mosaic_0001>

<bundles_post_ra>
// kernel: tpu_custom_call.1
= control target key start
LH: loop header
LB: loop body
LE: loop exit
PB: predicated region body
PF: predicated region fallthrough
CT: control target
= control target key end

     0   :  { %12 = vsyncpa [#allocation3], 0  ;;  %s2083_s0 = inlined_call_operand.hbm [shape: f32[2,8,32], index: 0, kind: input, shape index: {}]   ;;  %s2084_s1 = inlined_call_operand.vmem [shape: f32[1,32], index: 1, kind: input, shape index: {}]   ;;  %s2085_s2 = inlined_call_operand.vmem [shape: f32[1,32], index: 2, kind: input, shape index: {}]   ;;  %s2086_s3 = inlined_call_operand.hbm [shape: f32[32,96], index: 3, kind: input, shape index: {}]   ;;  %s2087_s4 = inlined_call_operand.vmem [shape: f32[1,96], index: 4, kind: input, shape index: {}]   ;;  %s2088_s5 = inlined_call_operand.hbm [shape: f32[32,32], index: 5, kind: input, shape index: {}]   ;;  %s2089_s6 = inlined_call_operand.vmem [shape: f32[1,32], index: 6, kind: input, shape index: {}]   ;;  %s2090_s7 = inlined_call_operand.hbm [shape: f32[2,8,32], index: 7, kind: output, shape index: {}]  }
   0x1   :  { %14 = vsyncpa [#allocation3 + $0x1], 0 }
   0x2   :  { %15 = vsyncpa [#allocation6], 0 }
   0x3   :  { %16 = vsyncpa [#allocation4], 0 }
   0x4   :  { %18 = vsyncpa [#allocation4 + $0x1], 0  ;;  %s1763_s24 = smov 0   ;;  %s1765_s25 = smov 0  }
   0x5   :  { %s1767_s26 = smov 0   ;;  %s1769_s27 = smov 0  }
   0x6 LB: > { %s1784_s28 = sadd.s32 4294967295, %s1698_s27   ;;  %s1304_s29 = sadd.s32 4294967294, %s1698_s27   ;;  %s1698_s27 = sphi %s1769_s27, %s2110_s27   ;;  %s1694_s26 = sphi %s1767_s26, %s2109_s26   ;;  %s1690_s25 = sphi %s1765_s25, %s2108_s25   ;;  %s1686_s24 = sphi %s1763_s24, %s2107_s24  }
   0x7   : > { %p44_p0 = scmp.ne.s32.totalorder %s1690_s25, %s1686_s24  ;;  %p2091_p1 = scmp.eq.s32.totalorder %s1784_s28, 0 }
   0x8   : > { %p200_p3 = scmp.eq.s32.totalorder %s1304_s29, 1  ;;  %p1305_p5 = scmp.ge.s32.totalorder %s1698_s27, 1 }
   0x9   : > { %p1793_p4 = por %p2091_p1, %p44_p0  ;;  %p207_p7 = scmp.lt.s32.totalorder %s1698_s27, 3 }
   0xa   : > { %p1798_p6 = por %p200_p3, %p44_p0  ;;  %s1700_s10 = smov [#allocation5]  }
   0xb   : > { %s2094_s30 = scalar_select %p1793_p4, 1, 0 }
   0xc   : > { %s2095_s8 = scalar_select %p1798_p6, 1, 0 }
   0xd   : > { %p1803_p8 = pnand %p1305_p5, %p207_p7  ;;  %s225_s11 = sshll.u32 %s1700_s10, 4  ;;  %s1807_s11 = int_to_ptr.vmem [resolvable:$true] %s225_s11 }
   0xe   : > { %s1701_s13 = smov [#allocation7]   ;;  %s1542_s17 = scalar_lea.hbm %s2086_s3, 512 }
   0xf   : > { %p1450_p9 = pneg %p1803_p8  ;;  %s241_s14 = sshll.u32 %s1701_s13, 4  ;;  %s1818_s14 = int_to_ptr.vmem [resolvable:$true] %s241_s14 }
  0x10   : > { %p1543_p12 = scmp.ne.s32.totalorder %s2086_s3, %s1542_s17  ;;  %p1549_p5 = scmp.lt.u32.totalorder %s1542_s17, %s2086_s3 }
  0x11   : > { %p1814_p11 = pnand %p1450_p9, %p2091_p1 }
  0x13   : > { %p1544_p13 = pneg %p1814_p11 }
  0x15   : > { %p1545_p0 = pnand %p1544_p13, %p1543_p12 }
  0x17   : > { %p1546_p3 = pneg %p1545_p0 }
  0x19   : > { %p1551_p7 = pnand %p1549_p5, %p1546_p3 }
  0x1b   : > { %1554 = shalt.err (!%p1551_p7)
}
  0x1c   : > { %s1555_s22 = scalar_lea.vmem %s1807_s11, 512  ;;  %p1563_p2 = scmp.lt.s32.totalorder %s1807_s11, %s1807_s11 }
  0x1d   : > { %p1556_p9 = scmp.ne.s32.totalorder %s1807_s11, %s1555_s22  ;;  %p1564_p12 = scmp.lt.s32.totalorder %s1555_s22, %s1555_s22 }
  0x1f   : > { %p1558_p10 = pnand %p1556_p9, %p1544_p13  ;;  %p1565_p0 = por %p1564_p12, %p1563_p2 }
  0x21   : > { %p1559_p1 = pneg %p1558_p10 }
  0x23   : > { %p1566_p6 = pnand %p1565_p0, %p1559_p1 }
  0x25   : > { %1569 = shalt.err (!%p1566_p6)
}
  0x26   : > { %s1702_s23 = smov 128   ;;  %s1703_s29 = smov 8  }
  0x27   : > { %1453 = dma.hbm_to_vmem [thread:$0]  (!%p1814_p11), %s2086_s3, 512, %s1807_s11, [#allocation6], %s1702_s23, %s1702_s23, %s1703_s29  }
  0x28   : > { %s1570_s17 = scalar_lea.hbm %s2088_s5, 512 }
  0x29   : > { %p1571_p2 = scmp.ne.s32.totalorder %s2088_s5, %s1570_s17  ;;  %p1577_p10 = scmp.lt.u32.totalorder %s1570_s17, %s2088_s5 }
  0x2b   : > { %p1573_p1 = pnand %p1571_p2, %p1544_p13 }
  0x2d   : > { %p1574_p6 = pneg %p1573_p1 }
  0x2f   : > { %p1579_p3 = pnand %p1577_p10, %p1574_p6 }
  0x31   : > { %1582 = shalt.err (!%p1579_p3)
}
  0x32   : > { %s1583_s11 = scalar_lea.vmem %s1818_s14, 512  ;;  %p1591_p12 = scmp.lt.s32.totalorder %s1818_s14, %s1818_s14 }
  0x33   : > { %p1584_p5 = scmp.ne.s32.totalorder %s1818_s14, %s1583_s11  ;;  %p1592_p0 = scmp.lt.s32.totalorder %s1583_s11, %s1583_s11 }
  0x35   : > { %p1586_p7 = pnand %p1584_p5, %p1544_p13  ;;  %p1593_p2 = por %p1592_p0, %p1591_p12 }
  0x37   : > { %p1587_p9 = pneg %p1586_p7 }
  0x39   : > { %p1594_p1 = pnand %p1593_p2, %p1587_p9 }
  0x3b   : > { %1597 = shalt.err (!%p1594_p1)
}
  0x3c   : > { %1456 = dma.hbm_to_vmem [thread:$0]  (!%p1814_p11), %s2088_s5, 512, %s1818_s14, [#allocation6], %s1702_s23, %s1702_s23, %s1703_s29  }
  0x3d   : > { %s1873_s13 = sadd.s32 1, %s1698_s27   ;;  %s31_s12 = sadd.s32 1, %s1694_s26 }
  0x3e   : > { %s28_s15 = ssub.s32 %s1698_s27, %s1873_s13  ;;  %p38_p13 = scmp.ne.s32.totalorder %s1694_s26, %s1690_s25 }
  0x3f   : > { %p29_p6 = scmp.eq.s32.totalorder %s28_s15, 0  ;;  %p39_p10 = scmp.eq.s32.totalorder %s1698_s27, 0 }
  0x40   : > { %p2098_p3 = scmp.eq.s32.totalorder %s1784_s28, 1  ;;  %p1467_p7 = scmp.lt.s32.totalorder %s1698_s27, 2 }
  0x41   : > { %s1889_s17 = scalar_select %p29_p6, %s1694_s26, %s31_s12  }
  0x42   : > { %p1883_p5 = por %p2098_p3, %p38_p13  ;;  %p40_p9 = por %p39_p10, %p38_p13 }
  0x43   : > { %s258_s18 = sand.u32 1, %s1694_s26   ;;  %s1310_s14 = sshll.u32 %s1698_s27, 7 }
  0x44   : > { %s2099_s16 = scalar_select %p1883_p5, 1, 0 }
  0x45   : > { %s1309_s19 = sshll.u32 %s258_s18, 3  ;;  %s1896_s20 = scalar_lea.hbm %s2083_s0, %s1310_s14 }
  0x46   : > { %s262_s21 = scalar_lea.vmem [#allocation2], %s1309_s19  ;;  %p1900_p11 = pnand %p1467_p7, %p40_p9 }
  0x47   : > { %s269_s11 = sshll.u32 %s262_s21, 4  ;;  %s259_s10 = scalar_lea.sflag [#allocation3], %s258_s18  ;;  %s1898_s11 = int_to_ptr.vmem [resolvable:$true] %s269_s11 }
  0x48   : > { %s1598_s12 = scalar_lea.hbm %s1896_s20, 128  ;;  %p1600_p0 = pneg %p1900_p11 }
  0x49   : > { %p1599_p12 = scmp.ne.s32.totalorder %s1896_s20, %s1598_s12  ;;  %s1603_s14 = scalar_lea.hbm %s2083_s0, 256 }
  0x4a   : > { %p1604_p13 = scmp.lt.u32.totalorder %s1896_s20, %s2083_s0  ;;  %p1605_p6 = scmp.lt.u32.totalorder %s1603_s14, %s1598_s12 }
  0x4b   : > { %p1601_p2 = pnand %p1600_p0, %p1599_p12  ;;  %p1607_p3 = scmp.lt.u32.totalorder %s1598_s12, %s1896_s20 }
  0x4c   : > { %p1606_p10 = por %p1605_p6, %p1604_p13 }
  0x4d   : > { %p1602_p1 = pneg %p1601_p2 }
  0x4e   : > { %p1608_p7 = por %p1607_p3, %p1606_p10 }
  0x50   : > { %p1609_p9 = pnand %p1608_p7, %p1602_p1 }
  0x52   : > { %1612 = shalt.err (!%p1609_p9)
}
  0x53   : > { %s1613_s18 = scalar_lea.vmem %s1898_s11, 128  ;;  %s1704_s21 = smov [#allocation2]  }
  0x54   : > { %p1614_p12 = scmp.ne.s32.totalorder %s1898_s11, %s1613_s18  ;;  %s1618_s15 = sshll.u32 %s1704_s21, 4  ;;  %s1619_s15 = int_to_ptr.vmem [resolvable:$false] %s1618_s15 }
  0x55   : > { %s1620_s19 = scalar_lea.vmem %s1619_s15, 256  ;;  %p1621_p4 = scmp.lt.s32.totalorder %s1898_s11, %s1619_s15 }
  0x56   : > { %p1616_p2 = pnand %p1614_p12, %p1600_p0  ;;  %p1622_p13 = scmp.lt.s32.totalorder %s1620_s19, %s1613_s18 }
  0x58   : > { %p1617_p5 = pneg %p1616_p2  ;;  %p1623_p6 = por %p1622_p13, %p1621_p4 }
  0x5a   : > { %p1624_p10 = pnand %p1623_p6, %p1617_p5 }
  0x5c   : > { %1627 = shalt.err (!%p1624_p10)
}
  0x5d   : > { %1460 = dma.hbm_to_vmem [thread:$0]  (!%p1900_p11), %s1896_s20, 128, %s1898_s11, %s259_s10  }
  0x5e   : > { %278 = sbr.rel (%p1803_p8) target bundleno = 2371 (0x943), region = 48  ;;  %s1932_s12 = sand.u32 (!%p1803_p8), 1, %s1690_s25  }
  0x5f   : > { %s1312_s14 = sshll.u32 (!%p1803_p8), %s1932_s12, 3  ;;  %s281_s23 = scalar_lea.sflag (!%p1803_p8), [#allocation3], %s1932_s12 }
  0x60   : > { %s284_s29 = scalar_lea.vmem (!%p1803_p8), [#allocation2], %s1312_s14  ;;  %p2101_p4 = scmp.ne.s32.totalorder (!%p1803_p8), %s2094_s30, 0 }
  0x65   : > { %1673 = dma.done.wait (%p2101_p4), %s281_s23, 128  }
  0x66   : > { %1675 = vsyncadd (%p2101_p4), %s281_s23, 4294967168  ;;  %p2102_p5 = scmp.eq.s32.totalorder %s1784_s28, 0 }
  0x68   : > { %1677 = dma.done.wait (%p2102_p5), [#allocation6], 1024   ;;  %p2103_p8 = pmov %p2102_p5 }
  0x69   : > { %vm324_vm0 = vcmask 261120   ;;  %v323_v0 = vld [vmem:[%s284_s29] sm:$0xff]  ;;  %v355_v7 = vld [vmem:[#allocation5] sm:$0xff]  ;;  %v356_v8 = vld [vmem:[#allocation5 + $0x8] sm:$0xff]  ;;  %v1705_v10 = vmov 0.0|0.0   ;;  %vm1706_vm1 = vmmov 0  }
  0x6a   : > { %1679 = vsyncadd (%p2103_p8), [#allocation6], 4294966272  ;;  %v325_v1 = vsel %vm324_vm0, %v323_v0, 0.0  ;;  %v357_v9 = vld [vmem:[#allocation5 + $0x10] sm:$0xff]  ;;  %1426 = vmatprep.subr.bf16.mxu0 %v1705_v10  ;;  %v1427_v11 = vpack.c.bf16 %v356_v8, %v355_v7  ;;  %v358_v12 = vld [vmem:[#allocation5 + $0x18] sm:$0xff]  ;;  %v1707_v13 = vmov 0.0  }
  0x6b   : > { %326 = vadd.xlane.f32.xlu0 %v325_v1  ;;  %1372 = vmatprep.mubr.msk.f32.mxu0 %vm1706_vm1, %v1707_v13  ;;  %v1430_v14 = vpack.c.bf16 %v358_v12, %v357_v9  ;;  %v1316_v19 = vld [vmem:[%s2084_s1] ss:$0 sm:$0xff]  ;;  %s1708_s18 = smov 64   ;;  %s1709_s21 = smov 96   ;;  %vm442_vm2 = vcmask 64512   ;;  %vm1112_vm3 = vcmask 130048  }
  0x6c   : > { %1375 = vmatprep.subr.mxu1 %v1707_v13  ;;  %1377 = vmatprep.mubr.msk.f32.mxu1 %vm1706_vm1, %v1707_v13  ;;  %v1317_v21 = vld [vmem:[%s2085_s2] ss:$0 sm:$0xff]  ;;  %s1710_s15 = smov 88   ;;  %s1711_s19 = smov 120   ;;  %vm1114_vm4 = vcmask 195584  }
  0x6d   : > { %1428 = vmatpush3.bf16.msra.mxu0 %v1427_v11  ;;  %v1318_v24 = vld [vmem:[%s2087_s4] ss:$0 sm:$0xff]  ;;  %s1712_s23 = smov 80   ;;  %s1713_s29 = smov 112  }
  0x6e   : > { %1429 = vmatprep.subr.bf16.mxu0 %v1705_v10  ;;  %s1714_s30 = smov 72   ;;  %s1715_s9 = smov 104  }
  0x6f   : > { %s1716_s20 = smov 48   ;;  %s1717_s11 = smov 56  }
  0x70   : > { %s1718_s22 = smov 40   ;;  %s1719_s10 = smov 8  }
  0x71   : > { %1431 = vmatpush3.bf16.msra.mxu0 %v1430_v14  ;;  %p2104_p0 = scmp.ne.s32.totalorder %s2099_s16, 0 }
  0x72   : > { %1395 = vmatprep.subr.mxu0 %v1707_v13 }
  0xf8   : > { %v327_v2 = vpop.xlane.xlu0 %326 }
  0xf9   : > { %v329_v3 = vmul.f32 0.03125, %v327_v2 }
  0xfb   : > { %v330_v4 = vsub.f32 %v323_v0, %v329_v3 }
  0xfd   : > { %v331_v5 = vmul.f32 %v330_v4, %v330_v4 }
  0xff   : > { %v332_v6 = vsel %vm324_vm0, %v331_v5, 0.0 }
 0x100   : > { %333 = vadd.xlane.f32.xlu0 %v332_v6 }
 0x18d   : > { %v334_v15 = vpop.xlane.xlu0 %333 }
 0x18e   : > { %v335_v16 = vmul.f32 0.03125, %v334_v15 }
 0x190   : > { %v336_v17 = vadd.f32 1e-05, %v335_v16 }
 0x192   : > { %1524 = vrsqrt.f32 %v336_v17 }
 0x19c   : > { %v1525_v18 = vpop.eup %1524 }
 0x19d   : > { %v338_v20 = vmul.f32 %v1525_v18, %v330_v4 }
 0x19f   : > { %v346_v22 = vmul.f32 %v1316_v19, %v338_v20 }
 0x1a1   : > { %v354_v23 = vadd.f32 %v1317_v21, %v346_v22 }
 0x1a3   : > { %1373 = vmatmul.mubr.msk.f32.vlgmr.msra.gmra.mrb[0].mxu0 %vm324_vm0, %v354_v23  ;;  %v1116_v23 = vld [vmem:[#allocation7] sm:$0xff] }
 0x1a4   : > { %1397 = vmatprep.mubr.msk.f32.mxu0 %vm1706_vm1, %v1707_v13 }
 0x276   : > { %v435_v25 = vpop.f32.mrb[0].mxu0 }
 0x277   : > { %v1968_v26 = vadd.f32 %v1318_v24, %v435_v25  ;;  %v1374_v27 = vpop.f32.mrb[1].mxu0  ;;  %v1117_v24 = vld [vmem:[#allocation7 + $0x8] sm:$0xff] }
 0x278   : > { %v1433_v25 = vpack.c.bf16 %v1117_v24, %v1116_v23  ;;  %v1119_v27 = vld [vmem:[#allocation7 + $0x18] sm:$0xff] }
 0x279   : > { %528 = vrot.lane.b32.xlu0 %v1968_v26, %s1708_s18  ;;  %440 = vrot.lane.b32.xlu1 %v1968_v26, %s1709_s21  ;;  %s1720_s18 = smov 16   ;;  %s1721_s21 = smov 24  }
 0x27d   : > { %606 = vrot.lane.b32.xlu0 %v1968_v26, %s1710_s15 }
 0x281   : > { %604 = vrot.lane.b32.xlu0 %v1968_v26, %s1711_s19 }
 0x2eb   : > { %v441_v28 = vpop.permute.xlu1 %440  ;;  %v529_v29 = vpop.permute.xlu0 %528 }
 0x2ec   : > { %1376 = vmatpush3.xpose.msk.msra.mxu1 %vm442_vm2, %v441_v28 }
 0x2ed   : > { %1380 = vmatprep.subr.mxu1 %v1707_v13 }
 0x2ef   : > { %1378 = vmatmul.mubr.msk.f32.vlgmr.msra.gmra.mrb[0].mxu1 %vm442_vm2, %v1968_v26  ;;  %v607_v39 = vpop.permute.xlu0 %606 }
 0x2f0   : > { %1381 = vmatpush3.msra.mxu1 %v529_v29  ;;  %1382 = vmatprep.mubr.msk.f32.mxu1 %vm1706_vm1, %v1707_v13 }
 0x2f1   : > { %1385 = vmatprep.subr.mxu1 %v1707_v13 }
 0x2f3   : > { %v605_v40 = vpop.permute.xlu0 %604 }
 0x3c2   : > { %v513_v30 = vpop.f32.mrb[0].mxu1 }
 0x3c3   : > { %v1379_v31 = vpop.f32.mrb[1].mxu1  ;;  %v517_v32 = vsel %vm442_vm2, %v513_v30, -inf }
 0x3c4   : > { %518 = vmax.xlane.f32.xlu1 %v517_v32 }
 0x3d5   : > { %771 = vrot.lane.b32.xlu1 %v1968_v26, %s1712_s23  ;;  %s1335_s23 = sshll.u32 %s1784_s28, 7 }
 0x451   : > { %v519_v33 = vpop.xlane.xlu1 %518 }
 0x452   : > { %v520_v34 = vsub.f32 %v513_v30, %v519_v33 }
 0x454   : > { %v521_v35 = vmul.f32 1.442695, %v520_v34 }
 0x455   : > { %v772_v36 = vpop.permute.xlu1 %771 }
 0x456   : > { %1526 = vpow2.f32 %v521_v35  ;;  %1396 = vmatpush3.xpose.msk.msra.mxu0 %vm442_vm2, %v772_v36 }
 0x457   : > { %1405 = vmatprep.subr.mxu0 %v1707_v13 }
 0x460   : > { %v1527_v37 = vpop.eup %1526 }
 0x461   : > { %v523_v38 = vsel %vm442_vm2, %v1527_v37, 0.0 }
 0x462   : > { %524 = vadd.xlane.f32.xlu0 %v523_v38 }
 0x478   : > { %769 = vrot.lane.b32.xlu0 %v1968_v26, %s1713_s29  ;;  %s322_s29 = scalar_lea.vmem [#allocation8], %s1312_s14  ;;  %s1722_s14 = smov [#allocation8]  }
 0x47c   : > { %936 = vrot.lane.b32.xlu0 %v1968_v26, %s1714_s30  ;;  %s1215_s30 = sshll.u32 %s322_s29, 4  ;;  %s2040_s30 = int_to_ptr.vmem [resolvable:$true] %s1215_s30 }
 0x47d   : > { %s1628_s28 = scalar_lea.vmem %s2040_s30, 128 }
 0x47e   : > { %p1629_p11 = scmp.ne.s32.totalorder %s2040_s30, %s1628_s28 }
 0x480   : > { %934 = vrot.lane.b32.xlu0 %v1968_v26, %s1715_s9  ;;  %p1630_p1 = pnand %p1629_p11, %p2104_p0 }
 0x482   : > { %p1631_p3 = pneg %p1630_p1 }
 0x4ef   : > { %v525_v41 = vpop.xlane.xlu0 %524 }
 0x4f0   : > { %1528 = vrcp.f32 %v525_v41 }
 0x4f3   : > { %v770_v42 = vpop.permute.xlu0 %769 }
 0x4f4   : > { %1398 = vmatmul.mubr.msk.f32.vlgmr.msra.gmra.mrb[2].mxu0 %vm442_vm2, %v770_v42 }
 0x4f5   : > { %1407 = vmatprep.mubr.msk.f32.mxu0 %vm1706_vm1, %v1707_v13 }
 0x4f7   : > { %v937_v43 = vpop.permute.xlu0 %936 }
 0x4f8   : > { %1406 = vmatpush3.xpose.msk.msra.mxu0 %vm442_vm2, %v937_v43 }
 0x4f9   : > { %1432 = vmatprep.subr.bf16.mxu0 %v1705_v10 }
 0x4fa   : > { %v1529_v44 = vpop.eup %1528 }
 0x4fb   : > { %v527_v45 = vmul.f32 %v1529_v44, %v1527_v37  ;;  %v935_v46 = vpop.permute.xlu0 %934 }
 0x4fc   : > { %1408 = vmatmul.mubr.msk.f32.vlgmr.msra.gmra.mrb[4].mxu0 %vm442_vm2, %v935_v46 }
 0x4fd   : > { %1383 = vmatmul.mubr.msk.f32.vlgmr.msra.gmra.mrb[2].mxu1 %vm442_vm2, %v527_v45  ;;  %1423 = vmatprep.mubr.msk.f32.mxu0 %vm1706_vm1, %v1707_v13 }
 0x4fe   : > { %1386 = vmatpush3.xpose.msk.msra.mxu1 %vm442_vm2, %v607_v39  ;;  %1387 = vmatprep.mubr.msk.f32.mxu1 %vm1706_vm1, %v1707_v13  ;;  %v1332_v39 = vld [vmem:[%s2089_s6] ss:$0 sm:$0xff] }
 0x4ff   : > { %1390 = vmatprep.subr.mxu1 %v1707_v13  ;;  %1434 = vmatpush3.bf16.msra.mxu0 %v1433_v25 }
 0x500   : > { %1435 = vmatprep.subr.bf16.mxu0 %v1705_v10 }
 0x501   : > { %1388 = vmatmul.mubr.msk.f32.vlgmr.msra.gmra.mrb[4].mxu1 %vm442_vm2, %v605_v40 }
 0x502   : > { %1392 = vmatprep.mubr.msk.f32.mxu1 %vm1706_vm1, %v1707_v13 }
 0x5c7   : > { %v843_v47 = vpop.f32.mrb[2].mxu0 }
 0x5c8   : > { %v1399_v48 = vpop.f32.mrb[3].mxu0  ;;  %v847_v49 = vsel %vm442_vm2, %v843_v47, -inf }
 0x5c9   : > { %848 = vmax.xlane.f32.xlu1 %v847_v49 }
 0x5cf   : > { %v1008_v50 = vpop.f32.mrb[4].mxu0 }
 0x5d0   : > { %v2006_v51 = vpop.f32.mrb[2].mxu1  ;;  %v1409_v52 = vpop.f32.mrb[5].mxu0  ;;  %v1012_v57 = vsel %vm442_vm2, %v1008_v50, -inf }
 0x5d1   : > { %v1384_v53 = vpop.f32.mrb[3].mxu1 }
 0x5d4   : > { %v678_v54 = vpop.f32.mrb[4].mxu1 }
 0x5d5   : > { %v1389_v55 = vpop.f32.mrb[5].mxu1  ;;  %v682_v56 = vsel %vm442_vm2, %v678_v54, -inf }
 0x5d6   : > { %683 = vmax.xlane.f32.xlu0 %v682_v56 }
 0x5da   : > { %1013 = vmax.xlane.f32.xlu0 %v1012_v57 }
 0x656   : > { %v849_v58 = vpop.xlane.xlu1 %848 }
 0x657   : > { %v850_v59 = vsub.f32 %v843_v47, %v849_v58 }
 0x659   : > { %v851_v60 = vmul.f32 1.442695, %v850_v59 }
 0x65b   : > { %1530 = vpow2.f32 %v851_v60 }
 0x663   : > { %v684_v61 = vpop.xlane.xlu0 %683 }
 0x664   : > { %v685_v62 = vsub.f32 %v678_v54, %v684_v61 }
 0x665   : > { %v1531_v63 = vpop.eup %1530 }
 0x666   : > { %v686_v0 = vmul.f32 1.442695, %v685_v62  ;;  %v853_v1 = vsel %vm442_vm2, %v1531_v63, 0.0 }
 0x667   : > { %854 = vadd.xlane.f32.xlu0 %v853_v1  ;;  %v1014_v2 = vpop.xlane.xlu0 %1013 }
 0x668   : > { %1532 = vpow2.f32 %v686_v0  ;;  %v1015_v3 = vsub.f32 %v1008_v50, %v1014_v2 }
 0x66a   : > { %v1016_v4 = vmul.f32 1.442695, %v1015_v3 }
 0x66c   : > { %1534 = vpow2.f32 %v1016_v4 }
 0x672   : > { %v1533_v5 = vpop.eup %1532 }
 0x673   : > { %v688_v6 = vsel %vm442_vm2, %v1533_v5, 0.0 }
 0x674   : > { %689 = vadd.xlane.f32.xlu0 %v688_v6 }
 0x676   : > { %v1535_v7 = vpop.eup %1534 }
 0x677   : > { %v1018_v8 = vsel %vm442_vm2, %v1535_v7, 0.0 }
 0x678   : > { %1019 = vadd.xlane.f32.xlu1 %v1018_v8 }
 0x689   : > { %858 = vrot.lane.b32.xlu1 %v1968_v26, %s1716_s20 }
 0x68a   : > { %693 = vrot.lane.b32.xlu0 %v1968_v26, %s1717_s11  ;;  %s2038_s11 = scalar_lea.hbm %s2090_s7, %s1335_s23 }
 0x68d   : > { %1023 = vrot.lane.b32.xlu1 %v1968_v26, %s1718_s22  ;;  %v1118_v26 = vld [vmem:[#allocation7 + $0x10] sm:$0xff]  ;;  %s1202_s22 = scalar_lea.sflag [#allocation4], %s1932_s12 }
 0x68e   : > { %v1436_v28 = vpack.c.bf16 %v1119_v27, %v1118_v26 }
 0x690   : > { %1437 = vmatpush3.bf16.msra.mxu0 %v1436_v28 }
 0x6f4   : > { %v855_v9 = vpop.xlane.xlu0 %854 }
 0x701   : > { %v690_v11 = vpop.xlane.xlu0 %689 }
 0x702   : > { %1536 = vrcp.f32 %v690_v11 }
 0x703   : > { %1538 = vrcp.f32 %v855_v9 }
 0x705   : > { %v1020_v12 = vpop.xlane.xlu1 %1019  ;;  %v694_v14 = vpop.permute.xlu0 %693 }
 0x706   : > { %1391 = vmatpush3.msra.mxu1 %v694_v14  ;;  %1540 = vrcp.f32 %v1020_v12 }
 0x707   : > { %1400 = vmatprep.subr.mxu1 %v1707_v13 }
 0x709   : > { %v859_v17 = vpop.permute.xlu1 %858 }
 0x70c   : > { %v1537_v15 = vpop.eup %1536 }
 0x70d   : > { %v692_v16 = vmul.f32 %v1537_v15, %v1533_v5  ;;  %v1539_v18 = vpop.eup %1538  ;;  %v1024_v21 = vpop.permute.xlu1 %1023 }
 0x70e   : > { %v857_v19 = vmul.f32 %v1539_v18, %v1531_v63 }
 0x70f   : > { %1393 = vmatmul.mubr.msk.f32.vlgmr.msra.gmra.mrb[6].mxu1 %vm442_vm2, %v692_v16 }
 0x710   : > { %1401 = vmatpush3.msra.mxu1 %v859_v17  ;;  %1402 = vmatprep.mubr.msk.f32.mxu1 %vm1706_vm1, %v1707_v13  ;;  %v1541_v20 = vpop.eup %1540 }
 0x711   : > { %1410 = vmatprep.subr.mxu1 %v1707_v13  ;;  %v1022_v22 = vmul.f32 %v1541_v20, %v1535_v7 }
 0x713   : > { %1403 = vmatmul.mubr.msk.f32.vlgmr.msra.gmra.mrb[8].mxu1 %vm442_vm2, %v857_v19 }
 0x714   : > { %1411 = vmatpush3.msra.mxu1 %v1024_v21  ;;  %1412 = vmatprep.mubr.msk.f32.mxu1 %vm1706_vm1, %v1707_v13 }
 0x717   : > { %1413 = vmatmul.mubr.msk.f32.vlgmr.msra.gmra.mrb[10].mxu1 %vm442_vm2, %v1022_v22 }
 0x7e2   : > { %v765_v29 = vpop.f32.mrb[6].mxu1 }
 0x7e3   : > { %1100 = vrot.lane.b32.xlu1 %v765_v29, %s1719_s10  ;;  %v1394_v30 = vpop.f32.mrb[7].mxu1  ;;  %s1632_s10 = sshll.u32 %s1722_s14, 4  ;;  %s1633_s10 = int_to_ptr.vmem [resolvable:$false] %s1632_s10 }
 0x7e4   : > { %p1635_p7 = scmp.lt.s32.totalorder %s2040_s30, %s1633_s10 }
 0x7e6   : > { %v930_v31 = vpop.f32.mrb[8].mxu1 }
 0x7e7   : > { %1104 = vrot.lane.b32.xlu0 %v930_v31, %s1720_s18  ;;  %v1404_v13 = vpop.f32.mrb[9].mxu1  ;;  %s1634_s18 = scalar_lea.vmem %s1633_s10, 256 }
 0x7e8   : > { %p1636_p9 = scmp.lt.s32.totalorder %s1634_s18, %s1628_s28 }
 0x7ea   : > { %v1095_v32 = vpop.f32.mrb[10].mxu1  ;;  %p1637_p12 = por %p1636_p9, %p1635_p7 }
 0x7eb   : > { %1108 = vrot.lane.b32.xlu1 %v1095_v32, %s1721_s21  ;;  %v1414_v33 = vpop.f32.mrb[11].mxu1 }
 0x7ec   : > { %p1638_p2 = pnand %p1637_p12, %p1631_p3 }
 0x855   : > { %v1101_v34 = vpop.permute.xlu1 %1100 }
 0x856   : > { %v1111_v35 = vsel %vm442_vm2, %v2006_v51, %v1101_v34 }
 0x859   : > { %v1105_v10 = vpop.permute.xlu0 %1104 }
 0x85a   : > { %v1113_v36 = vsel %vm1112_vm3, %v1111_v35, %v1105_v10 }
 0x85d   : > { %v1109_v37 = vpop.permute.xlu1 %1108 }
 0x85e   : > { %v1115_v38 = vsel %vm1114_vm4, %v1113_v36, %v1109_v37 }
 0x85f   : > { %1424 = vmatmul.mubr.msk.f32.vlgmr.msra.gmra.mrb[6].mxu0 %vm324_vm0, %v1115_v38 }
 0x932   : > { %v1196_v40 = vpop.f32.mrb[6].mxu0 }
 0x933   : > { %v1197_v41 = vadd.f32 %v1332_v39, %v1196_v40  ;;  %v1425_v42 = vpop.f32.mrb[7].mxu0 }
 0x935   : > { %1200 = vst.msk [vmem:[%s322_s29] sm:$0xff] %vm324_vm0, %v1197_v41 }
 0x936   : > { %1641 = shalt.err (!%p1638_p2)
}
 0x937   : > { %s1642_s12 = scalar_lea.hbm %s2038_s11, 128  ;;  %s1646_s19 = scalar_lea.hbm %s2090_s7, 256 }
 0x938   : > { %p1643_p13 = scmp.ne.s32.totalorder %s2038_s11, %s1642_s12  ;;  %p1647_p4 = scmp.lt.u32.totalorder %s2038_s11, %s2090_s7 }
 0x939   : > { %p1648_p5 = scmp.lt.u32.totalorder %s1646_s19, %s1642_s12  ;;  %p1650_p11 = scmp.lt.u32.totalorder %s1642_s12, %s2038_s11 }
 0x93a   : > { %p1644_p6 = pnand %p1643_p13, %p2104_p0 }
 0x93b   : > { %p1649_p8 = por %p1648_p5, %p1647_p4 }
 0x93c   : > { %p1645_p10 = pneg %p1644_p6 }
 0x93d   : > { %p1651_p1 = por %p1650_p11, %p1649_p8 }
 0x93f   : > { %p1652_p3 = pnand %p1651_p1, %p1645_p10 }
 0x941   : > { %1655 = shalt.err (!%p1652_p3)
}
 0x942   : > { %1448 = dma.vmem_to_hbm [thread:$0]  (%p2104_p0), %s2040_s30, 128, %s2038_s11, %s1202_s22  }
 0x943 PF: > { %s1227_s9 = sand.u32 1, %s1686_s24   ;;  %p2105_p7 = scmp.ne.s32.totalorder %s2095_s8, 0 }
 0x944   : > { %p2106_p9 = scmp.ge.s32.totalorder %s1698_s27, 2  ;;  %s1228_s20 = scalar_lea.sflag [#allocation4], %s1227_s9 }
 0x946   : > { %p1462_p12 = pnand %p2106_p9, %p2105_p7 }
 0x948   : > { %1681 = dma.done.wait (!%p1462_p12), %s1228_s20, 128  }
 0x949   : > { %1683 = vsyncadd (!%p1462_p12), %s1228_s20, 4294967168  ;;  %p21_p2 = scmp.ge.s32.totalorder %s1873_s13, 4   ;;  %s2107_s24 = smov %s1690_s25 }
 0x94a   : > { %s2108_s25 = smov %s1694_s26  ;;  %s2109_s26 = smov %s1889_s17 }
 0x94b   : > { %s2110_s27 = smov %s1873_s13  ;;  %23 = sbr.rel (!%p21_p2) target bundleno = 6 (0x6), region = 101 }
 0x952   :  { %1233 = vsyncpa [#allocation3], 1 }
 0x953   :  { %1235 = vsyncpa [#allocation3 + $0x1], 1 }
 0x954   :  { %1236 = vsyncpa [#allocation6], 1 }
 0x955   :  { %1237 = vsyncpa [#allocation4], 1 }
 0x956   :  { %1239 = vsyncpa [#allocation4 + $0x1], 1 }

</bundles_post_ra>
